<compile_context>
chip_gen: v5e
topology: v5e:2x2
jax: 0.10.0
libtpu: 0.0.40
codegen_flags: <defaults>
</compile_context>

<pallas_src>
import functools

import jax
import jax.numpy as jnp
from jax.experimental import pallas as pl
from jax.experimental.pallas import tpu as pltpu

_LANE = 128      # f32 vreg lane width
_SUBLANE = 8     # f32 vreg sublane count


def _round_up(n, m):
    return ((n + m - 1) // m) * m


def _fused_mlp_kernel(*refs, n_layers, activation):
    """Entire MLP forward in one kernel body.

    refs = (x_ref, w0, b0, w1, b1, ..., w_{L-1}, b_{L-1}, o_ref), all VMEM.
    x_ref : [tile_b, F_in_pad]
    w_l   : [F_in_pad_l, F_out_pad_l]   (already transposed vs. PyTorch)
    b_l   : [1, F_out_pad_l]
    o_ref : [tile_b, F_out_pad_last]
    """
    x_ref = refs[0]
    o_ref = refs[-1]
    h = x_ref[...]
    for l in range(n_layers):
        w = refs[1 + 2 * l][...]
        b = refs[2 + 2 * l][...]
        h = jnp.dot(h, w, preferred_element_type=jnp.float32) + b
        if l != n_layers - 1:
            if activation == "sigmoid":
                # exp goes to the EUP; reciprocal instead of a VALU divide.
                e = jnp.exp(-h)
                h = pl.reciprocal(1.0 + e, approx=False)
            elif activation == "tanh":
                h = jnp.tanh(h)
            # 'linear' -> identity
    o_ref[...] = h.astype(o_ref.dtype)


def init_ffnn_params(key, input_size, hidden_sizes, output_size=1,
                     dtype=jnp.float32):
    """Deterministic params mimicking nn.Linear default init
    (uniform(-1/sqrt(fan_in), 1/sqrt(fan_in)) for both weight and bias).
    Weights stored already transposed: [fan_in, fan_out]."""
    sizes = [input_size] + list(hidden_sizes) + [output_size]
    params = []
    for i in range(len(sizes) - 1):
        fan_in, fan_out = sizes[i], sizes[i + 1]
        key, kw, kb = jax.random.split(key, 3)
        bound = 1.0 / jnp.sqrt(jnp.asarray(fan_in, dtype))
        w_t = jax.random.uniform(kw, (fan_in, fan_out), dtype,
                                 minval=-bound, maxval=bound)
        b = jax.random.uniform(kb, (1, fan_out), dtype,
                               minval=-bound, maxval=bound)
        params.append((w_t, b))
    return params


def ffnn_forward(params, x, *, activation="sigmoid", batch_tile=256):
    """Forward pass identical to FFNNModel.forward: activation after every
    layer except the last (linear output). Single fused pallas_call."""
    batch, in_features = x.shape
    n_layers = len(params)
    out_features = params[-1][0].shape[1]

    # --- pad feature dims to lane width (zero-padding is exact: padded weight
    # rows/cols are zero, so padded lanes never contribute to valid outputs).
    padded = []
    for (w, b) in params:
        fi, fo = w.shape
        fi_p, fo_p = _round_up(fi, _LANE), _round_up(fo, _LANE)
        w_p = jnp.zeros((fi_p, fo_p), w.dtype).at[:fi, :fo].set(w)
        b_p = jnp.zeros((1, fo_p), b.dtype).at[:, :fo].set(b)
        padded.append((w_p, b_p))
    in_p = padded[0][0].shape[0]
    out_p = padded[-1][0].shape[1]

    # --- batch tiling: big tiles amortise the ~0.35 us/step overhead; the
    # batch axis is "parallel" so v7x can shard it across its 2 TensorCores.
    tile_b = _round_up(min(batch_tile, _round_up(batch, _SUBLANE)), _SUBLANE)
    batch_p = _round_up(batch, tile_b)
    x_p = jnp.zeros((batch_p, in_p), x.dtype).at[:batch, :in_features].set(x)

    grid = (batch_p // tile_b,)

    in_specs = [pl.BlockSpec((tile_b, in_p), lambda i: (i, 0))]
    flat_params = []
    for (w_p, b_p) in padded:
        # Weights/biases pinned in VMEM across all grid steps.
        in_specs.append(pl.BlockSpec(w_p.shape, lambda i: (0, 0)))
        in_specs.append(pl.BlockSpec(b_p.shape, lambda i: (0, 0)))
        flat_params += [w_p, b_p]
    out_specs = pl.BlockSpec((tile_b, out_p), lambda i: (i, 0))

    flops = 2 * batch_p * sum(w.shape[0] * w.shape[1] for (w, _) in padded)
    transcendentals = batch_p * sum(w.shape[1] for (w, _) in padded[:-1])
    bytes_accessed = 4 * (batch_p * in_p + batch_p * out_p
                          + sum(w.size + b.size for (w, b) in padded))

    kernel = functools.partial(_fused_mlp_kernel, n_layers=n_layers,
                               activation=activation)
    out_padded = pl.pallas_call(
        kernel,
        out_shape=jax.ShapeDtypeStruct((batch_p, out_p), x.dtype),
        grid=grid,
        in_specs=in_specs,
        out_specs=out_specs,
        compiler_params=pltpu.CompilerParams(
            dimension_semantics=("parallel",)),
        cost_estimate=pl.CostEstimate(flops=flops,
                                      transcendentals=transcendentals,
                                      bytes_accessed=bytes_accessed),
    )(x_p, *flat_params)

    # Slice away batch/feature padding (padded output lanes hold zeros).
    return out_padded[:batch, :out_features]


def ffnn_reference(params, x, activation="sigmoid"):
    """Pure-JAX reference for correctness check."""
    n_layers = len(params)
    for i, (w_t, b) in enumerate(params):
        x = x @ w_t + b
        if i != n_layers - 1:
            if activation == "sigmoid":
                x = jax.nn.sigmoid(x)
            elif activation == "tanh":
                x = jnp.tanh(x)
    return x


if __name__ == "__main__":
    key = jax.random.PRNGKey(0)
    key, kx = jax.random.split(key)

    # Small shapes consistent with the module: an MLP on flat feature vectors.
    batch = 8
    input_size = 16
    hidden_sizes = [32, 32]
    output_size = 1

    x = jax.random.normal(kx, (batch, input_size), jnp.float32)
    params = init_ffnn_params(key, input_size, hidden_sizes, output_size)

    out = ffnn_forward(params, x)
    out = jax.block_until_ready(out)

    ref = ffnn_reference(params, x)
    assert out.shape == (batch, output_size), out.shape
    assert jnp.allclose(out, ref, atol=1e-5, rtol=1e-5), (out, ref)

    print("KERNEL_OK")
</pallas_src>

<mosaic_0001>
module attributes {stable_mosaic.version = 11 : i64} {
  func.func @_fused_mlp_kernel(%arg0: i32, %arg1: memref<8x128xf32, #tpu.memory_space<vmem>>, %arg2: memref<128x128xf32, #tpu.memory_space<vmem>>, %arg3: memref<1x128xf32, #tpu.memory_space<vmem>>, %arg4: memref<128x128xf32, #tpu.memory_space<vmem>>, %arg5: memref<1x128xf32, #tpu.memory_space<vmem>>, %arg6: memref<128x128xf32, #tpu.memory_space<vmem>>, %arg7: memref<1x128xf32, #tpu.memory_space<vmem>>, %arg8: memref<8x128xf32, #tpu.memory_space<vmem>>) attributes {dimension_semantics = [#tpu.dimension_semantics<parallel>], iteration_bounds = array<i64: 1>, scalar_prefetch = 0 : i64, scratch_operands = 0 : i64, tpu.core_type = #tpu.core_type<tc>, window_params = [{transform_indices = @transform_0, window_bounds = array<i64: 8, 128>}, {pipeline_mode = #tpu.pipeline_mode<synchronous>, transform_indices = @transform_1, window_bounds = array<i64: 128, 128>}, {pipeline_mode = #tpu.pipeline_mode<synchronous>, transform_indices = @transform_2, window_bounds = array<i64: 1, 128>}, {pipeline_mode = #tpu.pipeline_mode<synchronous>, transform_indices = @transform_3, window_bounds = array<i64: 128, 128>}, {pipeline_mode = #tpu.pipeline_mode<synchronous>, transform_indices = @transform_4, window_bounds = array<i64: 1, 128>}, {pipeline_mode = #tpu.pipeline_mode<synchronous>, transform_indices = @transform_5, window_bounds = array<i64: 128, 128>}, {pipeline_mode = #tpu.pipeline_mode<synchronous>, transform_indices = @transform_6, window_bounds = array<i64: 1, 128>}, {transform_indices = @transform_7, window_bounds = array<i64: 8, 128>}]} {
    %c0 = arith.constant 0 : index
    %c0_0 = arith.constant 0 : index
    %0 = vector.load %arg1[%c0, %c0_0] : memref<8x128xf32, #tpu.memory_space<vmem>>, vector<8x128xf32>
    %c0_1 = arith.constant 0 : index
    %c0_2 = arith.constant 0 : index
    %1 = vector.load %arg2[%c0_1, %c0_2] : memref<128x128xf32, #tpu.memory_space<vmem>>, vector<128x128xf32>
    %c0_3 = arith.constant 0 : index
    %c0_4 = arith.constant 0 : index
    %2 = vector.load %arg3[%c0_3, %c0_4] : memref<1x128xf32, #tpu.memory_space<vmem>>, vector<1x128xf32>
    %cst = arith.constant dense<0.000000e+00> : vector<8x128xf32>
    %3 = tpu.matmul %0, %1, %cst {dimension_numbers = #tpu.dot_dimension_numbers<[1], [0], [0], [1], [0, 0, 1, 1], [], []>} : vector<8x128xf32>, vector<128x128xf32>, vector<8x128xf32> -> vector<8x128xf32>
    %4 = vector.broadcast %2 : vector<1x128xf32> to vector<8x128xf32>
    %5 = arith.addf %3, %4 : vector<8x128xf32>
    %cst_5 = arith.constant 0.000000e+00 : f32
    %6 = vector.broadcast %cst_5 : f32 to vector<8x128xf32>
    %7 = arith.subf %6, %5 : vector<8x128xf32>
    %8 = math.exp %7 : vector<8x128xf32>
    %cst_6 = arith.constant 1.000000e+00 : f32
    %9 = vector.broadcast %cst_6 : f32 to vector<8x128xf32>
    %10 = arith.addf %9, %8 : vector<8x128xf32>
    %11 = tpu.reciprocal %10 : vector<8x128xf32> -> vector<8x128xf32>
    %c0_7 = arith.constant 0 : index
    %c0_8 = arith.constant 0 : index
    %12 = vector.load %arg4[%c0_7, %c0_8] : memref<128x128xf32, #tpu.memory_space<vmem>>, vector<128x128xf32>
    %c0_9 = arith.constant 0 : index
    %c0_10 = arith.constant 0 : index
    %13 = vector.load %arg5[%c0_9, %c0_10] : memref<1x128xf32, #tpu.memory_space<vmem>>, vector<1x128xf32>
    %cst_11 = arith.constant dense<0.000000e+00> : vector<8x128xf32>
    %14 = tpu.matmul %11, %12, %cst_11 {dimension_numbers = #tpu.dot_dimension_numbers<[1], [0], [0], [1], [0, 0, 1, 1], [], []>} : vector<8x128xf32>, vector<128x128xf32>, vector<8x128xf32> -> vector<8x128xf32>
    %15 = vector.broadcast %13 : vector<1x128xf32> to vector<8x128xf32>
    %16 = arith.addf %14, %15 : vector<8x128xf32>
    %cst_12 = arith.constant 0.000000e+00 : f32
    %17 = vector.broadcast %cst_12 : f32 to vector<8x128xf32>
    %18 = arith.subf %17, %16 : vector<8x128xf32>
    %19 = math.exp %18 : vector<8x128xf32>
    %cst_13 = arith.constant 1.000000e+00 : f32
    %20 = vector.broadcast %cst_13 : f32 to vector<8x128xf32>
    %21 = arith.addf %20, %19 : vector<8x128xf32>
    %22 = tpu.reciprocal %21 : vector<8x128xf32> -> vector<8x128xf32>
    %c0_14 = arith.constant 0 : index
    %c0_15 = arith.constant 0 : index
    %23 = vector.load %arg6[%c0_14, %c0_15] : memref<128x128xf32, #tpu.memory_space<vmem>>, vector<128x128xf32>
    %c0_16 = arith.constant 0 : index
    %c0_17 = arith.constant 0 : index
    %24 = vector.load %arg7[%c0_16, %c0_17] : memref<1x128xf32, #tpu.memory_space<vmem>>, vector<1x128xf32>
    %cst_18 = arith.constant dense<0.000000e+00> : vector<8x128xf32>
    %25 = tpu.matmul %22, %23, %cst_18 {dimension_numbers = #tpu.dot_dimension_numbers<[1], [0], [0], [1], [0, 0, 1, 1], [], []>} : vector<8x128xf32>, vector<128x128xf32>, vector<8x128xf32> -> vector<8x128xf32>
    %26 = vector.broadcast %24 : vector<1x128xf32> to vector<8x128xf32>
    %27 = arith.addf %25, %26 : vector<8x128xf32>
    %c0_19 = arith.constant 0 : index
    %c0_20 = arith.constant 0 : index
    %28 = vector.load %arg8[%c0_19, %c0_20] : memref<8x128xf32, #tpu.memory_space<vmem>>, vector<8x128xf32>
    tpu.vector_store %arg8[%c0_19, %c0_20], %27 {strides = array<i32>} : memref<8x128xf32, #tpu.memory_space<vmem>>, vector<8x128xf32>,
    return
  }
  func.func @transform_0(%arg0: i32) -> (i32, i32) {
    %c0_i32 = arith.constant 0 : i32
    %c0_i32_0 = arith.constant 0 : i32
    return %arg0, %c0_i32 : i32, i32
  }
  func.func @transform_1(%arg0: i32) -> (i32, i32) {
    %c0_i32 = arith.constant 0 : i32
    %c0_i32_0 = arith.constant 0 : i32
    %c0_i32_1 = arith.constant 0 : i32
    return %c0_i32, %c0_i32_0 : i32, i32
  }
  func.func @transform_2(%arg0: i32) -> (i32, i32) {
    %c0_i32 = arith.constant 0 : i32
    %c0_i32_0 = arith.constant 0 : i32
    %c0_i32_1 = arith.constant 0 : i32
    return %c0_i32, %c0_i32_0 : i32, i32
  }
  func.func @transform_3(%arg0: i32) -> (i32, i32) {
    %c0_i32 = arith.constant 0 : i32
    %c0_i32_0 = arith.constant 0 : i32
    %c0_i32_1 = arith.constant 0 : i32
    return %c0_i32, %c0_i32_0 : i32, i32
  }
  func.func @transform_4(%arg0: i32) -> (i32, i32) {
    %c0_i32 = arith.constant 0 : i32
    %c0_i32_0 = arith.constant 0 : i32
    %c0_i32_1 = arith.constant 0 : i32
    return %c0_i32, %c0_i32_0 : i32, i32
  }
  func.func @transform_5(%arg0: i32) -> (i32, i32) {
    %c0_i32 = arith.constant 0 : i32
    %c0_i32_0 = arith.constant 0 : i32
    %c0_i32_1 = arith.constant 0 : i32
    return %c0_i32, %c0_i32_0 : i32, i32
  }
  func.func @transform_6(%arg0: i32) -> (i32, i32) {
    %c0_i32 = arith.constant 0 : i32
    %c0_i32_0 = arith.constant 0 : i32
    %c0_i32_1 = arith.constant 0 : i32
    return %c0_i32, %c0_i32_0 : i32, i32
  }
  func.func @transform_7(%arg0: i32) -> (i32, i32) {
    %c0_i32 = arith.constant 0 : i32
    %c0_i32_0 = arith.constant 0 : i32
    return %arg0, %c0_i32 : i32, i32
  }
}

</mosaic_0001>

<bundles_post_ra>
// kernel: tpu_custom_call.1
= control target key start
LH: loop header
LB: loop body
LE: loop exit
PB: predicated region body
PF: predicated region fallthrough
CT: control target
= control target key end

     0   :  { %12 = vsyncpa [#allocation3], 0  ;;  %s482_s0 = inlined_call_operand.hbm [shape: f32[8,128], index: 0, kind: input, shape index: {}]   ;;  %s483_s1 = inlined_call_operand.hbm [shape: f32[128,128], index: 1, kind: input, shape index: {}]   ;;  %s484_s2 = inlined_call_operand.vmem [shape: f32[1,128], index: 2, kind: input, shape index: {}]   ;;  %s485_s3 = inlined_call_operand.hbm [shape: f32[128,128], index: 3, kind: input, shape index: {}]   ;;  %s486_s4 = inlined_call_operand.vmem [shape: f32[1,128], index: 4, kind: input, shape index: {}]   ;;  %s487_s5 = inlined_call_operand.hbm [shape: f32[128,128], index: 5, kind: input, shape index: {}]   ;;  %s488_s6 = inlined_call_operand.vmem [shape: f32[1,128], index: 6, kind: input, shape index: {}]   ;;  %s489_s7 = inlined_call_operand.hbm [shape: f32[8,128], index: 7, kind: output, shape index: {}]  }
   0x1   :  { %13 = vsyncpa [#allocation6], 0 }
   0x2   :  { %14 = vsyncpa [#allocation9], 0  ;;  %s31_s26 = sshll.u32 %s483_s1, 4  ;;  %s32_s26 = int_to_ptr.hbm [resolvable:$true] %s31_s26 }
   0x3   :  { %15 = vsyncpa [#allocation4], 0  ;;  %s411_s27 = smov [#allocation5]   ;;  %s21_s8 = sshll.u32 %s482_s0, 4  ;;  %s22_s8 = int_to_ptr.hbm [resolvable:$true] %s21_s8 }
   0x4   :  { %s33_s28 = sshll.u32 %s411_s27, 4  ;;  %s412_s9 = smov 128   ;;  %s34_s28 = int_to_ptr.vmem [resolvable:$true] %s33_s28 }
   0x5   :  { %s413_s10 = smov 8   ;;  %s414_s11 = smov [#allocation2]  }
   0x6   :  { %39 = dma.hbm_to_vmem [thread:$0]  %s32_s26, 2048, %s34_s28, [#allocation6], %s412_s9, %s412_s9, %s413_s10  }
   0x7   :  { %s23_s12 = sshll.u32 %s414_s11, 4  ;;  %s46_s15 = sshll.u32 %s485_s3, 4  ;;  %s24_s12 = int_to_ptr.vmem [resolvable:$true] %s23_s12  ;;  %s47_s15 = int_to_ptr.hbm [resolvable:$true] %s46_s15 }
   0x8   :  { %26 = dma.hbm_to_vmem [thread:$0]  %s22_s8, 128, %s24_s12, [#allocation3]  }
   0x9   :  { %s61_s17 = sshll.u32 %s487_s5, 4  ;;  %s415_s18 = smov [#allocation7]   ;;  %s62_s17 = int_to_ptr.hbm [resolvable:$true] %s61_s17 }
   0xa   :  { %s48_s19 = sshll.u32 %s415_s18, 4  ;;  %s416_s0 = smov [#allocation8]   ;;  %s49_s19 = int_to_ptr.vmem [resolvable:$true] %s48_s19 }
   0xb   :  { %54 = dma.hbm_to_vmem [thread:$0]  %s47_s15, 2048, %s49_s19, [#allocation6], %s412_s9, %s412_s9, %s413_s10  }
   0xc   :  { %s63_s20 = sshll.u32 %s416_s0, 4  ;;  %s64_s20 = int_to_ptr.vmem [resolvable:$true] %s63_s20 }
   0xd   :  { %69 = dma.hbm_to_vmem [thread:$0]  %s62_s17, 2048, %s64_s20, [#allocation9], %s412_s9, %s412_s9, %s413_s10  }
   0xe   :  { %403 = dma.done.wait [#allocation3], 128  }
   0xf   :  { %404 = vsyncadd [#allocation3], 4294967168 }
  0x10   :  { %405 = dma.done.wait [#allocation6], 4096  }
  0x11   :  { %406 = vsyncadd [#allocation6], 4294963200 }
  0x12   :  { %407 = dma.done.wait [#allocation9], 2048  }
  0x13   :  { %408 = vsyncadd [#allocation9], 4294965248  ;;  %v104_v0 = vld [vmem:[#allocation5 + $0x78] sm:$0xff]  ;;  %v103_v1 = vld [vmem:[#allocation5 + $0x70] sm:$0xff]  ;;  %s417_s23 = smov [#allocation10]   ;;  %s253_s27 = sshll.u32 %s489_s7, 4  ;;  %s254_s27 = int_to_ptr.hbm [resolvable:$true] %s253_s27 }
  0x14   :  { %109 = vmatpush.msra.mxu0 %v104_v0  ;;  %v102_v2 = vld [vmem:[#allocation5 + $0x68] sm:$0xff]  ;;  %v101_v3 = vld [vmem:[#allocation5 + $0x60] sm:$0xff]  ;;  %v100_v4 = vld [vmem:[#allocation5 + $0x58] sm:$0xff]  ;;  %s251_s24 = sshll.u32 %s417_s23, 4  ;;  %s252_s24 = int_to_ptr.vmem [resolvable:$true] %s251_s24 }
  0x15   :  { %v99_v5 = vld [vmem:[#allocation5 + $0x50] sm:$0xff]  ;;  %v98_v6 = vld [vmem:[#allocation5 + $0x48] sm:$0xff]  ;;  %v97_v7 = vld [vmem:[#allocation5 + $0x40] sm:$0xff] }
  0x16   :  { %110 = vmatpush.msra.mxu0 %v103_v1  ;;  %v96_v8 = vld [vmem:[#allocation5 + $0x38] sm:$0xff]  ;;  %v95_v9 = vld [vmem:[#allocation5 + $0x30] sm:$0xff]  ;;  %v94_v10 = vld [vmem:[#allocation5 + $0x28] sm:$0xff] }
  0x17   :  { %v93_v11 = vld [vmem:[#allocation5 + $0x20] sm:$0xff]  ;;  %v92_v12 = vld [vmem:[#allocation5 + $0x18] sm:$0xff]  ;;  %v91_v13 = vld [vmem:[#allocation5 + $0x10] sm:$0xff] }
  0x18   :  { %111 = vmatpush.msra.mxu0 %v102_v2  ;;  %v90_v14 = vld [vmem:[#allocation5 + $0x8] sm:$0xff]  ;;  %v89_v15 = vld [vmem:[#allocation5] sm:$0xff]  ;;  %v88_v16 = vld [vmem:[#allocation2] sm:$0xff] }
  0x19   :  { %v162_v17 = vld [vmem:[#allocation7 + $0x78] sm:$0xff]  ;;  %v161_v18 = vld [vmem:[#allocation7 + $0x70] sm:$0xff]  ;;  %v160_v19 = vld [vmem:[#allocation7 + $0x68] sm:$0xff] }
  0x1a   :  { %112 = vmatpush.msra.mxu0 %v101_v3  ;;  %167 = vmatpush.msra.mxu1 %v162_v17  ;;  %v159_v20 = vld [vmem:[#allocation7 + $0x60] sm:$0xff]  ;;  %v158_v21 = vld [vmem:[#allocation7 + $0x58] sm:$0xff]  ;;  %v157_v22 = vld [vmem:[#allocation7 + $0x50] sm:$0xff] }
  0x1b   :  { %v156_v23 = vld [vmem:[#allocation7 + $0x48] sm:$0xff]  ;;  %v155_v24 = vld [vmem:[#allocation7 + $0x40] sm:$0xff]  ;;  %v154_v25 = vld [vmem:[#allocation7 + $0x38] sm:$0xff] }
  0x1c   :  { %113 = vmatpush.msra.mxu0 %v100_v4  ;;  %168 = vmatpush.msra.mxu1 %v161_v18  ;;  %v153_v26 = vld [vmem:[#allocation7 + $0x30] sm:$0xff]  ;;  %v152_v27 = vld [vmem:[#allocation7 + $0x28] sm:$0xff]  ;;  %v151_v28 = vld [vmem:[#allocation7 + $0x20] sm:$0xff] }
  0x1d   :  { %v150_v29 = vld [vmem:[#allocation7 + $0x18] sm:$0xff]  ;;  %v149_v30 = vld [vmem:[#allocation7 + $0x10] sm:$0xff]  ;;  %v148_v31 = vld [vmem:[#allocation7 + $0x8] sm:$0xff] }
  0x1e   :  { %114 = vmatpush.msra.mxu0 %v99_v5  ;;  %169 = vmatpush.msra.mxu1 %v160_v19  ;;  %v272_v32 = vld [vmem:[%s484_s2] ss:$0 sm:$0xff]  ;;  %v147_v33 = vld [vmem:[#allocation7] sm:$0xff]  ;;  %v219_v51 = vld [vmem:[#allocation8 + $0x70] sm:$0xff] }
  0x1f   :  { %v220_v50 = vld [vmem:[#allocation8 + $0x78] sm:$0xff]  ;;  %v218_v52 = vld [vmem:[#allocation8 + $0x68] sm:$0xff]  ;;  %v217_v53 = vld [vmem:[#allocation8 + $0x60] sm:$0xff] }
  0x20   :  { %115 = vmatpush.msra.mxu0 %v98_v6  ;;  %170 = vmatpush.msra.mxu1 %v159_v20  ;;  %v216_v54 = vld [vmem:[#allocation8 + $0x58] sm:$0xff]  ;;  %v215_v55 = vld [vmem:[#allocation8 + $0x50] sm:$0xff]  ;;  %v214_v56 = vld [vmem:[#allocation8 + $0x48] sm:$0xff] }
  0x21   :  { %225 = vmatpush.msra.mxu2 %v220_v50  ;;  %v213_v57 = vld [vmem:[#allocation8 + $0x40] sm:$0xff]  ;;  %v212_v58 = vld [vmem:[#allocation8 + $0x38] sm:$0xff]  ;;  %v211_v59 = vld [vmem:[#allocation8 + $0x30] sm:$0xff] }
  0x22   :  { %116 = vmatpush.msra.mxu0 %v97_v7  ;;  %171 = vmatpush.msra.mxu1 %v158_v21  ;;  %v210_v60 = vld [vmem:[#allocation8 + $0x28] sm:$0xff]  ;;  %v209_v61 = vld [vmem:[#allocation8 + $0x20] sm:$0xff]  ;;  %v208_v62 = vld [vmem:[#allocation8 + $0x18] sm:$0xff] }
  0x23   :  { %226 = vmatpush.msra.mxu2 %v219_v51  ;;  %v207_v63 = vld [vmem:[#allocation8 + $0x10] sm:$0xff]  ;;  %v206_v0 = vld [vmem:[#allocation8 + $0x8] sm:$0xff]  ;;  %v273_v1 = vld [vmem:[%s486_s4] ss:$0 sm:$0xff] }
  0x24   :  { %117 = vmatpush.msra.mxu0 %v96_v8  ;;  %172 = vmatpush.msra.mxu1 %v157_v22  ;;  %v205_v2 = vld [vmem:[#allocation8] sm:$0xff]  ;;  %v274_v19 = vld [vmem:[%s488_s6] ss:$0 sm:$0xff] }
  0x25   :  { %227 = vmatpush.msra.mxu2 %v218_v52 }
  0x26   :  { %118 = vmatpush.msra.mxu0 %v95_v9  ;;  %173 = vmatpush.msra.mxu1 %v156_v23 }
  0x27   :  { %228 = vmatpush.msra.mxu2 %v217_v53 }
  0x28   :  { %119 = vmatpush.msra.mxu0 %v94_v10  ;;  %174 = vmatpush.msra.mxu1 %v155_v24 }
  0x29   :  { %229 = vmatpush.msra.mxu2 %v216_v54 }
  0x2a   :  { %120 = vmatpush.msra.mxu0 %v93_v11  ;;  %175 = vmatpush.msra.mxu1 %v154_v25 }
  0x2b   :  { %230 = vmatpush.msra.mxu2 %v215_v55 }
  0x2c   :  { %121 = vmatpush.msra.mxu0 %v92_v12  ;;  %176 = vmatpush.msra.mxu1 %v153_v26 }
  0x2d   :  { %231 = vmatpush.msra.mxu2 %v214_v56 }
  0x2e   :  { %122 = vmatpush.msra.mxu0 %v91_v13  ;;  %177 = vmatpush.msra.mxu1 %v152_v27 }
  0x2f   :  { %232 = vmatpush.msra.mxu2 %v213_v57 }
  0x30   :  { %123 = vmatpush.msra.mxu0 %v90_v14  ;;  %178 = vmatpush.msra.mxu1 %v151_v28 }
  0x31   :  { %233 = vmatpush.msra.mxu2 %v212_v58 }
  0x32   :  { %124 = vmatpush.msra.mxu0 %v89_v15  ;;  %179 = vmatpush.msra.mxu1 %v150_v29 }
  0x33   :  { %125 = vmatmul.f32.vlgmr.msra.gmra.mxu0 %v88_v16  ;;  %234 = vmatpush.msra.mxu2 %v211_v59 }
  0x34   :  { %180 = vmatpush.msra.mxu1 %v149_v30 }
  0x35   :  { %235 = vmatpush.msra.mxu2 %v210_v60 }
  0x36   :  { %181 = vmatpush.msra.mxu1 %v148_v31 }
  0x37   :  { %236 = vmatpush.msra.mxu2 %v209_v61 }
  0x38   :  { %182 = vmatpush.msra.mxu1 %v147_v33 }
  0x39   :  { %237 = vmatpush.msra.mxu2 %v208_v62 }
  0x3b   :  { %238 = vmatpush.msra.mxu2 %v207_v63 }
  0x3d   :  { %239 = vmatpush.msra.mxu2 %v206_v0 }
  0x3f   :  { %240 = vmatpush.msra.mxu2 %v205_v2 }
  0xb0   :  { %v126_v34 = vpop.f32.mrf.mxu0 }
  0xb1   :  { %v127_v35 = vadd.f32 %v272_v32, %v126_v34 }
  0xb3   :  { %v129_v36 = vsub.f32 0.0, %v127_v35 }
  0xb5   :  { %v130_v37 = vmul.f32 1.442695, %v129_v36 }
  0xb7   :  { %275 = vpow2.f32 %v130_v37 }
  0xbd   :  { %v276_v38 = vpop.eup %275 }
  0xbe   :  { %v132_v39 = vadd.f32 1.0, %v276_v38 }
  0xc0   :  { %277 = vrcp.f32 %v132_v39  ;;  %v144_v43 = vand.u32 2147483648, %v132_v39  ;;  %v142_v45 = vand.u32 2147483647, %v132_v39  ;;  %vm138_vm1 = vweird.f32 %v132_v39 }
  0xc2   :  { %v145_v47 = vor.u32 1.1754944e-38, %v144_v43  ;;  %vm143_vm3 = vcmp.eq.f32.partialorder %v142_v45, 8.507059e+37 }
  0xc6   :  { %v278_v40 = vpop.eup %277 }
  0xc7   :  { %v134_v41 = vmul.f32 %v278_v40, %v132_v39  ;;  %vm139_vm0 = vweird.f32 %v278_v40 }
  0xc8   :  { %vm140_vm2 = vmor %vm138_vm1, %vm139_vm0 }
  0xc9   :  { %v135_v42 = vsub.f32 1.0, %v134_v41 }
  0xcb   :  { %v136_v44 = vmul.f32 %v278_v40, %v135_v42 }
  0xcd   :  { %v137_v46 = vadd.f32 %v278_v40, %v136_v44 }
  0xcf   :  { %v141_v48 = vsel %vm140_vm2, %v278_v40, %v137_v46 }
  0xd0   :  { %v146_v49 = vsel %vm143_vm3, %v145_v47, %v141_v48 }
  0xd1   :  { %183 = vmatmul.f32.vlgmr.msra.gmra.mxu1 %v146_v49 }
 0x14e   :  { %v184_v3 = vpop.f32.mrf.mxu1 }
 0x14f   :  { %v185_v4 = vadd.f32 %v273_v1, %v184_v3 }
 0x151   :  { %v187_v5 = vsub.f32 0.0, %v185_v4 }
 0x153   :  { %v188_v6 = vmul.f32 1.442695, %v187_v5 }
 0x155   :  { %279 = vpow2.f32 %v188_v6 }
 0x15b   :  { %v280_v7 = vpop.eup %279 }
 0x15c   :  { %v190_v8 = vadd.f32 1.0, %v280_v7 }
 0x15e   :  { %281 = vrcp.f32 %v190_v8  ;;  %v202_v12 = vand.u32 2147483648, %v190_v8  ;;  %v200_v14 = vand.u32 2147483647, %v190_v8  ;;  %vm196_vm5 = vweird.f32 %v190_v8 }
 0x160   :  { %v203_v16 = vor.u32 1.1754944e-38, %v202_v12  ;;  %vm201_vm7 = vcmp.eq.f32.partialorder %v200_v14, 8.507059e+37 }
 0x164   :  { %v282_v9 = vpop.eup %281 }
 0x165   :  { %v192_v10 = vmul.f32 %v282_v9, %v190_v8  ;;  %vm197_vm4 = vweird.f32 %v282_v9 }
 0x166   :  { %vm198_vm6 = vmor %vm196_vm5, %vm197_vm4 }
 0x167   :  { %v193_v11 = vsub.f32 1.0, %v192_v10 }
 0x169   :  { %v194_v13 = vmul.f32 %v282_v9, %v193_v11 }
 0x16b   :  { %v195_v15 = vadd.f32 %v282_v9, %v194_v13 }
 0x16d   :  { %v199_v17 = vsel %vm198_vm6, %v282_v9, %v195_v15 }
 0x16e   :  { %v204_v18 = vsel %vm201_vm7, %v203_v16, %v199_v17 }
 0x16f   :  { %241 = vmatmul.f32.vlgmr.msra.gmra.mxu2 %v204_v18 }
 0x1f2   :  { %v242_v20 = vpop.f32.mrf.mxu2 }
 0x1f3   :  { %v243_v21 = vadd.f32 %v274_v19, %v242_v20 }
 0x1f5   :  { %245 = vst [vmem:[#allocation10] sm:$0xff] %v243_v21 }
 0x1f6   :  { %256 = dma.vmem_to_hbm [thread:$0]  %s252_s24, 128, %s254_s27, [#allocation4]  }
 0x1f7   :  { %409 = dma.done.wait [#allocation4], 128  }
 0x1f8   :  { %410 = vsyncadd [#allocation4], 4294967168 }
 0x1f9   :  { %261 = vsyncpa [#allocation3], 1 }
 0x1fa   :  { %262 = vsyncpa [#allocation6], 1 }
 0x1fb   :  { %263 = vsyncpa [#allocation9], 1 }
 0x1fc   :  { %264 = vsyncpa [#allocation4], 1 }

</bundles_post_ra>
